<compile_context>
chip_gen: v6e
topology: v6e:2x2x1
jax: 0.10.0
libtpu: 0.0.40
codegen_flags: <defaults>
</compile_context>

<pallas_src>
import math

import jax
import jax.numpy as jnp
from jax.experimental import pallas as pl
from jax.experimental.pallas import tpu as pltpu


def se_kernel(x_ref, w1_ref, w2_ref, o_ref):
    # x_ref : (tm, Cw)   w1_ref : (Cw, Hw)   w2_ref : (Hw, Cw)   o_ref : (tm, Cw)
    x = x_ref[...]                                        # native dtype, streamed

    # fc1 (no bias) + ReLU, f32 accumulation on the MXU.
    h = jnp.dot(x, w1_ref[...], preferred_element_type=jnp.float32)
    h = jnp.maximum(h, 0.0).astype(w2_ref.dtype)

    # fc2 (no bias) + Sigmoid (EUP, f32).
    y = jnp.dot(h, w2_ref[...], preferred_element_type=jnp.float32)
    y = jax.nn.sigmoid(y)

    # Gate in f32, cast only at the store (avoids bf16 VPU round trip on v5e).
    o_ref[...] = (x.astype(jnp.float32) * y).astype(o_ref.dtype)


def _pack_dims(C):
    """Choose padded channel width and row-packing factor so Cw = P*C_pad is a
    multiple of 128 (lane-dense stores)."""
    if C <= 128:
        c_pad = 1
        while c_pad < C:
            c_pad *= 2                      # powers of two <= 128 divide 128
        c_pad = min(c_pad, 128)
        return c_pad, 128 // c_pad
    return -(-C // 128) * 128, 1


def prepare_se_weights(w1, w2, dtype):
    """One-time weight prep: transpose, cast, pad, block-diagonalize.

    w1 : (H, C)  fc1 weight (PyTorch nn.Linear layout: out_features, in_features)
    w2 : (C, H)  fc2 weight
    Returns (w1_k, w2_k, pack_meta) consumed by se_layer_packed.
    """
    H, C = w1.shape
    assert w2.shape == (C, H), (w1.shape, w2.shape)
    C_pad, P = _pack_dims(C)

    w1_t = w1.T.astype(dtype)               # (C, H)
    w2_t = w2.T.astype(dtype)               # (H, C)
    if C_pad != C:
        w1_t = jnp.pad(w1_t, ((0, C_pad - C), (0, 0)))   # zero in-channels
        w2_t = jnp.pad(w2_t, ((0, 0), (0, C_pad - C)))   # zero out-channels
    if P > 1:
        eye = jnp.eye(P, dtype=dtype)
        w1_k = jnp.kron(eye, w1_t)           # (P*C_pad, P*H) block-diagonal
        w2_k = jnp.kron(eye, w2_t)           # (P*H, P*C_pad) block-diagonal
    else:
        w1_k, w2_k = w1_t, w2_t
    return w1_k, w2_k, (C, C_pad, P)


def se_layer_packed(x, w1_k, w2_k, pack, *, block_rows=None):
    """Apply the fused SE gate given pre-packed weights."""
    orig_shape = x.shape
    C, C_pad, P = pack
    assert orig_shape[-1] == C
    M = math.prod(orig_shape[:-1])
    dt = x.dtype
    itemsize = jnp.dtype(dt).itemsize

    Cw = P * C_pad                           # multiple of 128 by construction
    Hw = w1_k.shape[1]

    # ---- lane-dense 2-D view (pad channels / rows only when needed).
    x2 = x.reshape(M, C)
    if C_pad != C:
        x2 = jnp.pad(x2, ((0, 0), (0, C_pad - C)))
    M_pad = -(-M // P) * P
    if M_pad != M:
        x2 = jnp.pad(x2, ((0, M_pad - M), (0, 0)))
    Mw = M_pad // P
    x_w = x2.reshape(Mw, Cw)                 # free when no padding happened

    # ---- row-tile sizing (generation-aware VMEM budget, even grid length).
    sub = 8 if itemsize >= 4 else 8 * (4 // itemsize)     # 8 f32 / 16 bf16 / 32 i8
    if block_rows is None:
        block_rows = max(sub, (4 << 20) // (Cw * itemsize))    # ~4 MiB of x / step

    # Cap by a 40 MiB VMEM budget: x+out double-buffered + f32 intermediates.
    per_row_bytes = 4 * Cw * itemsize + (2 * Cw + Hw) * 4
    tm_cap = max(sub, ((40 << 20) // per_row_bytes) // sub * sub)
    tm = min(int(block_rows), Mw, tm_cap)

    if tm < Mw:
        g = pl.cdiv(Mw, tm)
        if Mw >= 4 * sub:
            g = max(g, 4)                    # >=2 steps per TensorCore
        if g % 2:
            g += 1                           # even split across v7x's two TCs
        tm = max(sub, pl.cdiv(pl.cdiv(Mw, g), sub) * sub)
    grid = (pl.cdiv(Mw, tm),)

    # ---- explicit scoped-VMEM limit (v5e default is 16 MiB; v7x physical 64 MiB).
    footprint = (4 * tm * Cw * itemsize            # x + out, double-buffered
                 + tm * (2 * Cw + Hw) * 4          # f32 x, y, h intermediates
                 + 4 * Cw * Hw * itemsize)         # resident weights (2 bufs each)
    vmem_limit = int(min(48 << 20, max(32 << 20, int(footprint * 1.4) + (2 << 20))))

    cost = pl.CostEstimate(
        flops=4 * Mw * Cw * Hw,                    # two matmuls
        transcendentals=Mw * Cw,                   # sigmoid
        bytes_accessed=2 * Mw * Cw * itemsize + 2 * Cw * Hw * itemsize,
    )

    out = pl.pallas_call(
        se_kernel,
        out_shape=jax.ShapeDtypeStruct((Mw, Cw), dt),
        grid_spec=pltpu.PrefetchScalarGridSpec(
            num_scalar_prefetch=0,
            grid=grid,
            in_specs=[
                pl.BlockSpec((tm, Cw), lambda i: (i, 0)),   # streamed row tiles
                pl.BlockSpec((Cw, Hw), lambda i: (0, 0)),   # VMEM-resident weights
                pl.BlockSpec((Hw, Cw), lambda i: (0, 0)),
            ],
            out_specs=pl.BlockSpec((tm, Cw), lambda i: (i, 0)),
        ),
        compiler_params=pltpu.CompilerParams(
            dimension_semantics=("parallel",),
            vmem_limit_bytes=vmem_limit,
        ),
        cost_estimate=cost,
    )(x_w, w1_k, w2_k)

    # ---- unpack / strip padding.
    out2 = out.reshape(M_pad, C_pad)
    if M_pad != M or C_pad != C:
        out2 = out2[:M, :C]
    return out2.reshape(orig_shape)


def se_layer(x, w1, w2, *, block_rows=None):
    """Fused SE gating: x * sigmoid(relu(x @ w1.T) @ w2.T).

    x  : (..., C) input (Linear acts on the last dim).
    w1 : (H, C)  fc1 weight, PyTorch layout.   w2 : (C, H)  fc2 weight.
    Weight prep is cheap and fuses under jit; for a fixed layer it can also be
    hoisted by calling prepare_se_weights once and se_layer_packed per step.
    """
    w1_k, w2_k, pack = prepare_se_weights(w1, w2, x.dtype)
    return se_layer_packed(x, w1_k, w2_k, pack, block_rows=block_rows)


if __name__ == "__main__":
    # Small shapes consistent with the module: channel=64, reduction=16 -> hidden=4.
    B, N, C = 2, 8, 64
    reduction = 16
    H = C // reduction

    key = jax.random.PRNGKey(0)
    kx, kb, k1, k2, kc, k3, k4 = jax.random.split(key, 7)

    x = jax.random.normal(kx, (B, N, C), dtype=jnp.float32)
    w1 = jax.random.normal(k1, (H, C), dtype=jnp.float32) * (1.0 / C ** 0.5)
    w2 = jax.random.normal(k2, (C, H), dtype=jnp.float32) * (1.0 / H ** 0.5)

    def ref_fn(xx, a, b):
        h = jnp.maximum(xx @ a.T, 0.0)
        return xx * jax.nn.sigmoid(h @ b.T)

    fused = jax.jit(se_layer)

    # small case (single tile, P=2 lane packing)
    out = fused(x, w1, w2)
    jax.block_until_ready(out)
    assert out.shape == x.shape and out.dtype == x.dtype
    assert jnp.allclose(out, ref_fn(x, w1, w2), atol=1e-5, rtol=1e-5), "mismatch (small)"

    # multi-step pipelined grid (several row tiles, even grid length)
    x_big = jax.random.normal(kb, (4, 1024, C), dtype=jnp.float32)
    out_big = jax.jit(lambda xx: se_layer(xx, w1, w2, block_rows=512))(x_big)
    jax.block_until_ready(out_big)
    assert jnp.allclose(out_big, ref_fn(x_big, w1, w2), atol=1e-5, rtol=1e-5), \
        "mismatch (tiled)"

    # awkward channel count -> exercises the zero-padded lane-dense fallback
    C2 = 48
    H2 = C2 // reduction
    x_c = jax.random.normal(kc, (2, 10, C2), dtype=jnp.float32)
    w1_c = jax.random.normal(k3, (H2, C2), dtype=jnp.float32) * (1.0 / C2 ** 0.5)
    w2_c = jax.random.normal(k4, (C2, H2), dtype=jnp.float32) * (1.0 / H2 ** 0.5)
    out_c = jax.jit(se_layer)(x_c, w1_c, w2_c)
    jax.block_until_ready(out_c)
    assert jnp.allclose(out_c, ref_fn(x_c, w1_c, w2_c), atol=1e-5, rtol=1e-5), \
        "mismatch (padded C)"

    print("KERNEL_OK")
</pallas_src>

<mosaic_0001>
module attributes {stable_mosaic.version = 11 : i64} {
  func.func @se_kernel(%arg0: i32, %arg1: memref<8x128xf32, #tpu.memory_space<vmem>>, %arg2: memref<128x8xf32, #tpu.memory_space<vmem>>, %arg3: memref<8x128xf32, #tpu.memory_space<vmem>>, %arg4: memref<8x128xf32, #tpu.memory_space<vmem>>) attributes {dimension_semantics = [#tpu.dimension_semantics<parallel>], iteration_bounds = array<i64: 1>, scalar_prefetch = 0 : i64, scratch_operands = 0 : i64, tpu.core_type = #tpu.core_type<tc>, window_params = [{transform_indices = @transform_0, window_bounds = array<i64: 8, 128>}, {pipeline_mode = #tpu.pipeline_mode<synchronous>, transform_indices = @transform_1, window_bounds = array<i64: 128, 8>}, {pipeline_mode = #tpu.pipeline_mode<synchronous>, transform_indices = @transform_2, window_bounds = array<i64: 8, 128>}, {transform_indices = @transform_3, window_bounds = array<i64: 8, 128>}]} {
    %c0 = arith.constant 0 : index
    %c0_0 = arith.constant 0 : index
    %0 = vector.load %arg1[%c0, %c0_0] : memref<8x128xf32, #tpu.memory_space<vmem>>, vector<8x128xf32>
    %c0_1 = arith.constant 0 : index
    %c0_2 = arith.constant 0 : index
    %1 = vector.load %arg2[%c0_1, %c0_2] : memref<128x8xf32, #tpu.memory_space<vmem>>, vector<128x8xf32>
    %cst = arith.constant dense<0.000000e+00> : vector<8x8xf32>
    %2 = tpu.matmul %0, %1, %cst {dimension_numbers = #tpu.dot_dimension_numbers<[1], [0], [0], [1], [0, 0, 1, 1], [], []>} : vector<8x128xf32>, vector<128x8xf32>, vector<8x8xf32> -> vector<8x8xf32>
    %cst_3 = arith.constant 0.000000e+00 : f32
    %3 = vector.broadcast %cst_3 : f32 to vector<8x8xf32>
    %4 = arith.maximumf %2, %3 : vector<8x8xf32>
    %c0_4 = arith.constant 0 : index
    %c0_5 = arith.constant 0 : index
    %5 = vector.load %arg3[%c0_4, %c0_5] : memref<8x128xf32, #tpu.memory_space<vmem>>, vector<8x128xf32>
    %cst_6 = arith.constant dense<0.000000e+00> : vector<8x128xf32>
    %6 = tpu.matmul %4, %5, %cst_6 {dimension_numbers = #tpu.dot_dimension_numbers<[1], [0], [0], [1], [0, 0, 1, 1], [], []>} : vector<8x8xf32>, vector<8x128xf32>, vector<8x128xf32> -> vector<8x128xf32>
    %7 = arith.negf %6 : vector<8x128xf32>
    %8 = math.exp %7 : vector<8x128xf32>
    %cst_7 = arith.constant 1.000000e+00 : f32
    %9 = vector.broadcast %cst_7 : f32 to vector<8x128xf32>
    %10 = arith.addf %9, %8 : vector<8x128xf32>
    %11 = arith.divf %9, %10 : vector<8x128xf32>
    %12 = arith.mulf %0, %11 : vector<8x128xf32>
    %c0_8 = arith.constant 0 : index
    %c0_9 = arith.constant 0 : index
    %13 = vector.load %arg4[%c0_8, %c0_9] : memref<8x128xf32, #tpu.memory_space<vmem>>, vector<8x128xf32>
    tpu.vector_store %arg4[%c0_8, %c0_9], %12 {strides = array<i32>} : memref<8x128xf32, #tpu.memory_space<vmem>>, vector<8x128xf32>,
    return
  }
  func.func @transform_0(%arg0: i32) -> (i32, i32) {
    %c0_i32 = arith.constant 0 : i32
    %c0_i32_0 = arith.constant 0 : i32
    return %arg0, %c0_i32 : i32, i32
  }
  func.func @transform_1(%arg0: i32) -> (i32, i32) {
    %c0_i32 = arith.constant 0 : i32
    %c0_i32_0 = arith.constant 0 : i32
    %c0_i32_1 = arith.constant 0 : i32
    return %c0_i32, %c0_i32_0 : i32, i32
  }
  func.func @transform_2(%arg0: i32) -> (i32, i32) {
    %c0_i32 = arith.constant 0 : i32
    %c0_i32_0 = arith.constant 0 : i32
    %c0_i32_1 = arith.constant 0 : i32
    return %c0_i32, %c0_i32_0 : i32, i32
  }
  func.func @transform_3(%arg0: i32) -> (i32, i32) {
    %c0_i32 = arith.constant 0 : i32
    %c0_i32_0 = arith.constant 0 : i32
    return %arg0, %c0_i32 : i32, i32
  }
}

</mosaic_0001>

<bundles_post_ra>
// kernel: se_layer.1
= control target key start
LH: loop header
LB: loop body
LE: loop exit
PB: predicated region body
PF: predicated region fallthrough
CT: control target
= control target key end

     0   :  { %v256_v0 = vmov 0.0   ;;  %vm257_vm0 = vmmov 0   ;;  %vm103_vm1 = vcmask 64512   ;;  %s335_s1 = inlined_call_operand.vmem [shape: f32[128,8], index: 1, kind: input, shape index: {}]   ;;  %s336_s0 = inlined_call_operand.vmem [shape: f32[8,128], index: 0, kind: input, shape index: {}]   ;;  %s337_s2 = inlined_call_operand.vmem [shape: f32[8,128], index: 2, kind: input, shape index: {}]   ;;  %s338_s3 = inlined_call_operand.vmem [shape: f32[8,128], index: 3, kind: output, shape index: {}]  }
   0x1   :  { %210 = vmatprep.subr.mxu0 %v256_v0  ;;  %v30_v1 = vld [vmem:[%s335_s1 + $0x78] sm:$0xff]  ;;  %v29_v2 = vld [vmem:[%s335_s1 + $0x70] sm:$0xff]  ;;  %242 = vmatprep.mubr.msk.f32.mxu0 %vm257_vm0, %v256_v0  ;;  %v28_v3 = vld [vmem:[%s335_s1 + $0x68] sm:$0xff] }
   0x2   :  { %211 = vmatpush3.msra.mxu0 %v30_v1  ;;  %245 = vmatprep.subr.mxu1 %v256_v0  ;;  %v27_v4 = vld [vmem:[%s335_s1 + $0x60] sm:$0xff]  ;;  %v26_v5 = vld [vmem:[%s335_s1 + $0x58] sm:$0xff]  ;;  %v25_v6 = vld [vmem:[%s335_s1 + $0x50] sm:$0xff] }
   0x3   :  { %212 = vmatprep.subr.mxu0 %v256_v0  ;;  %247 = vmatprep.mubr.msk.f32.mxu1 %vm257_vm0, %v256_v0  ;;  %v24_v7 = vld [vmem:[%s335_s1 + $0x48] sm:$0xff]  ;;  %v23_v8 = vld [vmem:[%s335_s1 + $0x40] sm:$0xff]  ;;  %v22_v9 = vld [vmem:[%s335_s1 + $0x38] sm:$0xff] }
   0x4   :  { %213 = vmatpush3.msra.mxu0 %v29_v2  ;;  %v21_v10 = vld [vmem:[%s335_s1 + $0x30] sm:$0xff]  ;;  %v20_v11 = vld [vmem:[%s335_s1 + $0x28] sm:$0xff]  ;;  %v19_v12 = vld [vmem:[%s335_s1 + $0x20] sm:$0xff] }
   0x5   :  { %214 = vmatprep.subr.mxu0 %v256_v0  ;;  %v18_v13 = vld [vmem:[%s335_s1 + $0x18] sm:$0xff]  ;;  %v17_v14 = vld [vmem:[%s335_s1 + $0x10] sm:$0xff]  ;;  %v16_v15 = vld [vmem:[%s335_s1 + $0x8] sm:$0xff] }
   0x6   :  { %215 = vmatpush3.msra.mxu0 %v28_v3  ;;  %v15_v16 = vld [vmem:[%s335_s1] sm:$0xff] }
   0x7   :  { %216 = vmatprep.subr.mxu0 %v256_v0  ;;  %v14_v17 = vld [vmem:[%s336_s0] sm:$0xff] }
   0x8   :  { %217 = vmatpush3.msra.mxu0 %v27_v4  ;;  %v102_v18 = vld [vmem:[%s337_s2] sm:$0xff] }
   0x9   :  { %218 = vmatprep.subr.mxu0 %v256_v0  ;;  %246 = vmatpush3.msra.mxu1 %v102_v18 }
   0xa   :  { %219 = vmatpush3.msra.mxu0 %v26_v5 }
   0xb   :  { %220 = vmatprep.subr.mxu0 %v256_v0 }
   0xc   :  { %221 = vmatpush3.msra.mxu0 %v25_v6 }
   0xd   :  { %222 = vmatprep.subr.mxu0 %v256_v0 }
   0xe   :  { %223 = vmatpush3.msra.mxu0 %v24_v7 }
   0xf   :  { %224 = vmatprep.subr.mxu0 %v256_v0 }
  0x10   :  { %225 = vmatpush3.msra.mxu0 %v23_v8 }
  0x11   :  { %226 = vmatprep.subr.mxu0 %v256_v0 }
  0x12   :  { %227 = vmatpush3.msra.mxu0 %v22_v9 }
  0x13   :  { %228 = vmatprep.subr.mxu0 %v256_v0 }
  0x14   :  { %229 = vmatpush3.msra.mxu0 %v21_v10 }
  0x15   :  { %230 = vmatprep.subr.mxu0 %v256_v0 }
  0x16   :  { %231 = vmatpush3.msra.mxu0 %v20_v11 }
  0x17   :  { %232 = vmatprep.subr.mxu0 %v256_v0 }
  0x18   :  { %233 = vmatpush3.msra.mxu0 %v19_v12 }
  0x19   :  { %234 = vmatprep.subr.mxu0 %v256_v0 }
  0x1a   :  { %235 = vmatpush3.msra.mxu0 %v18_v13 }
  0x1b   :  { %236 = vmatprep.subr.mxu0 %v256_v0 }
  0x1c   :  { %237 = vmatpush3.msra.mxu0 %v17_v14 }
  0x1d   :  { %238 = vmatprep.subr.mxu0 %v256_v0 }
  0x1e   :  { %239 = vmatpush3.msra.mxu0 %v16_v15 }
  0x1f   :  { %240 = vmatprep.subr.mxu0 %v256_v0 }
  0x20   :  { %241 = vmatpush3.msra.mxu0 %v15_v16 }
  0x21   :  { %243 = vmatmul.mubr.f32.vlgmr.msra.gmra.mxu0 %v14_v17 }
  0xe1   :  { %v97_v19 = vpop.f32.mrf.mxu0 }
  0xe2   :  { %v101_v20 = vmax.f32 %v97_v19, 0.0 }
  0xe3   :  { %v244_v21 = vpop.f32.mrf.mxu0 }
  0xe4   :  { %248 = vmatmul.mubr.msk.f32.vlgmr.msra.gmra.mxu1 %vm103_vm1, %v101_v20 }
 0x1a4   :  { %v173_v22 = vpop.f32.mrf.mxu1 }
 0x1a5   :  { %v190_v23 = vmul.f32 -1.442695, %v173_v22 }
 0x1a6   :  { %v249_v24 = vpop.f32.mrf.mxu1 }
 0x1a7   :  { %252 = vpow2.f32 %v190_v23 }
 0x1b4   :  { %v253_v25 = vpop.eup %252 }
 0x1b5   :  { %v180_v26 = vadd.f32 1.0, %v253_v25 }
 0x1b7   :  { %254 = vrcp.f32 %v180_v26 }
 0x1c4   :  { %v255_v27 = vpop.eup %254 }
 0x1c5   :  { %v183_v28 = vmul.f32 %v255_v27, %v14_v17 }
 0x1c7   :  { %184 = vst [vmem:[%s338_s3] sm:$0xff] %v183_v28 }

</bundles_post_ra>
